<compile_context>
chip_gen: v7x
topology: tpu7x:2x2x1
jax: 0.10.0
libtpu: 0.0.40
codegen_flags: <defaults>
</compile_context>

<pallas_src>
import functools

import jax
import jax.numpy as jnp
from jax import lax
from jax.experimental import pallas as pl
from jax.experimental.pallas import tpu as pltpu

# Mirrors the (module-level) global `K` referenced in the PyTorch forward.
K = 2


def _l1_partial_kernel(gt_ref, pred_ref, acc_ref, *, n, tn, tiles_per_p):
    """Accumulate |pred - gt| into a lane-dense (R, TN) f32 accumulator.

    gt_ref / pred_ref : (R, TN) VMEM tiles   (R = B*K rows, TN lanes)
    acc_ref           : (R, TN) VMEM, resident across the inner (reduction) axis
    """
    p = pl.program_id(0)   # partition (parallel axis)
    j = pl.program_id(1)   # lane-tile within partition (reduction axis)

    @pl.when(j == 0)
    def _init():
        acc_ref[...] = jnp.zeros_like(acc_ref)

    diff = jnp.abs(
        pred_ref[...].astype(jnp.float32) - gt_ref[...].astype(jnp.float32)
    )

    if n % tn != 0:
        # The boundary tile extends past the true data length; zero the garbage
        # lanes with a cheap VPU cmp+select (no extra HBM traffic).
        tile_idx = p * tiles_per_p + j
        lane = lax.broadcasted_iota(jnp.int32, diff.shape, 1)
        diff = jnp.where(tile_idx * tn + lane < n, diff, 0.0)

    acc_ref[...] += diff


def per_channel_l1(gt_mags_sq, pred_mags_sq, *, tn=8192, num_partitions=2):
    """Returns a (K,) array of mean |pred[:, k] - gt[:, k]| over (B, H, W)."""
    assert gt_mags_sq.shape == pred_mags_sq.shape
    b, k, h, w = gt_mags_sq.shape
    n = h * w
    r = b * k

    # Zero-copy view of the contiguous NCHW layout:
    #   rows  = (batch, channel) pairs -> sublanes
    #   lanes = flattened spatial reduction axis
    gt2 = gt_mags_sq.reshape(r, n)
    pr2 = pred_mags_sq.reshape(r, n)

    # Lane tile: big (amortize per-step overhead), multiple of 128, capped to
    # the lane-rounded data size.
    n_lanes = pl.cdiv(n, 128) * 128
    tn = max(128, min((tn // 128) * 128, n_lanes))
    num_tiles = pl.cdiv(n, tn)

    # 2-way partition of the reduction stream (uses both TensorCores on v7x);
    # falls back to a single partition when the tile count does not split evenly.
    p = num_partitions if (num_tiles >= num_partitions
                           and num_tiles % num_partitions == 0) else 1
    tiles_per_p = num_tiles // p

    kernel = functools.partial(
        _l1_partial_kernel, n=n, tn=tn, tiles_per_p=tiles_per_p)

    itemsize = jnp.dtype(gt2.dtype).itemsize
    cost = pl.CostEstimate(
        flops=3 * r * n,                                    # sub + abs + add
        transcendentals=0,
        bytes_accessed=2 * r * n * itemsize + p * r * tn * 4,
    )

    partials = pl.pallas_call(
        kernel,
        out_shape=jax.ShapeDtypeStruct((p, r, tn), jnp.float32),
        grid_spec=pltpu.PrefetchScalarGridSpec(
            num_scalar_prefetch=0,
            grid=(p, tiles_per_p),
            in_specs=[
                pl.BlockSpec((r, tn), lambda pi, j: (0, pi * tiles_per_p + j)),
                pl.BlockSpec((r, tn), lambda pi, j: (0, pi * tiles_per_p + j)),
            ],
            out_specs=pl.BlockSpec((None, r, tn), lambda pi, j: (pi, 0, 0)),
        ),
        compiler_params=pltpu.CompilerParams(
            dimension_semantics=("parallel", "arbitrary"),
        ),
        cost_estimate=cost,
    )(gt2, pr2)

    # Tiny epilogue on a few-KB array: sum partitions + lanes, fold batch into
    # each channel, normalize by the true element count (mean over B, H, W).
    per_row = jnp.sum(partials, axis=(0, 2))            # (B*K,)
    per_channel = per_row.reshape(b, k).sum(axis=0)      # (K,)
    return per_channel * (1.0 / float(b * n))


class IndividualLosses:
    """JAX/Pallas port of the PyTorch IndividualLosses module."""

    def __init__(self, main_device=None):
        self.main_device = main_device  # kept for API parity; unused

    def __call__(self, x):
        gt_mags_sq, pred_mags_sq, _, _, _, _ = x
        losses = per_channel_l1(gt_mags_sq, pred_mags_sq)
        l1 = losses[0]
        l2 = losses[1]
        if K == 4:
            l3 = losses[2]
            l4 = losses[3]
            return [l1, l2, l3, l4]
        return [l1, l2]


def _check(gt, pred, **kwargs):
    got = per_channel_l1(gt, pred, **kwargs)
    got = jax.block_until_ready(got)
    k = gt.shape[1]
    ref = jnp.stack([jnp.mean(jnp.abs(pred[:, c] - gt[:, c])) for c in range(k)])
    assert jnp.allclose(got, ref, rtol=1e-5, atol=1e-5), (got, ref)


if __name__ == "__main__":
    key = jax.random.PRNGKey(0)
    k_gt, k_pr, k_gt2, k_pr2, k_gt3, k_pr3 = jax.random.split(key, 6)

    # 1) Module-consistent shapes: (batch, K channels, H, W), module path.
    B, H, W = 2, 16, 16
    gt = jax.random.normal(k_gt, (B, K, H, W), dtype=jnp.float32)
    pred = jax.random.normal(k_pr, (B, K, H, W), dtype=jnp.float32)

    module = IndividualLosses(main_device=None)
    losses = module((gt, pred, None, None, None, None))
    losses = [jax.block_until_ready(l) for l in losses]
    ref = [jnp.mean(jnp.abs(pred[:, c] - gt[:, c])) for c in range(K)]
    for got, want in zip(losses, ref):
        assert jnp.allclose(got, want, rtol=1e-5, atol=1e-5), (got, want)

    # 2) Ragged spatial size (H*W not a multiple of the lane tile): mask path.
    gt_r = jax.random.normal(k_gt2, (2, K, 10, 20), dtype=jnp.float32)
    pred_r = jax.random.normal(k_pr2, (2, K, 10, 20), dtype=jnp.float32)
    _check(gt_r, pred_r)

    # 3) Multi-tile + 2-way partitioned reduction (small tn to force >1 tile).
    gt_p = jax.random.normal(k_gt3, (2, K, 32, 32), dtype=jnp.float32)
    pred_p = jax.random.normal(k_pr3, (2, K, 32, 32), dtype=jnp.float32)
    _check(gt_p, pred_p, tn=128)

    print("KERNEL_OK")
</pallas_src>

<mosaic_0001>
module attributes {stable_mosaic.version = 11 : i64} {
  func.func @_l1_partial_kernel(%arg0: i32, %arg1: i32, %arg2: memref<4x256xf32, #tpu.memory_space<vmem>>, %arg3: memref<4x256xf32, #tpu.memory_space<vmem>>, %arg4: memref<1x4x256xf32, #tpu.memory_space<vmem>>) attributes {dimension_semantics = [#tpu.dimension_semantics<parallel>, #tpu.dimension_semantics<arbitrary>], iteration_bounds = array<i64: 1, 1>, scalar_prefetch = 0 : i64, scratch_operands = 0 : i64, tpu.core_type = #tpu.core_type<tc>, window_params = [{transform_indices = @transform_0, window_bounds = array<i64: 4, 256>}, {transform_indices = @transform_1, window_bounds = array<i64: 4, 256>}, {transform_indices = @transform_2, window_bounds = array<i64: 1, 4, 256>}]} {
    %c0_i32 = arith.constant 0 : i32
    %0 = arith.cmpi eq, %arg1, %c0_i32 : i32
    %1 = arith.extui %0 : i1 to i32
    %c0_i32_0 = arith.constant 0 : i32
    %2 = arith.cmpi ne, %1, %c0_i32_0 : i32
    scf.if %2 {
      %cst = arith.constant 0.000000e+00 : f32
      %13 = vector.broadcast %cst : f32 to vector<4x256xf32>
      %c0_10 = arith.constant 0 : index
      %c0_11 = arith.constant 0 : index
      %c0_12 = arith.constant 0 : index
      %14 = vector.load %arg4[%c0_10, %c0_11, %c0_12] : memref<1x4x256xf32, #tpu.memory_space<vmem>>, vector<1x4x256xf32>
      %15 = vector.shape_cast %14 : vector<1x4x256xf32> to vector<4x256xf32>
      %16 = vector.shape_cast %13 : vector<4x256xf32> to vector<1x4x256xf32>
      tpu.vector_store %arg4[%c0_10, %c0_11, %c0_12], %16 {strides = array<i32>} : memref<1x4x256xf32, #tpu.memory_space<vmem>>, vector<1x4x256xf32>,
    } else {
    }
    %c0 = arith.constant 0 : index
    %c0_1 = arith.constant 0 : index
    %3 = vector.load %arg3[%c0, %c0_1] : memref<4x256xf32, #tpu.memory_space<vmem>>, vector<4x256xf32>
    %c0_2 = arith.constant 0 : index
    %c0_3 = arith.constant 0 : index
    %4 = vector.load %arg2[%c0_2, %c0_3] : memref<4x256xf32, #tpu.memory_space<vmem>>, vector<4x256xf32>
    %5 = arith.subf %3, %4 : vector<4x256xf32>
    %6 = math.absf %5 : vector<4x256xf32>
    %c0_4 = arith.constant 0 : index
    %c0_5 = arith.constant 0 : index
    %c0_6 = arith.constant 0 : index
    %7 = vector.load %arg4[%c0_4, %c0_5, %c0_6] : memref<1x4x256xf32, #tpu.memory_space<vmem>>, vector<1x4x256xf32>
    %8 = vector.shape_cast %7 : vector<1x4x256xf32> to vector<4x256xf32>
    %9 = arith.addf %8, %6 : vector<4x256xf32>
    %c0_7 = arith.constant 0 : index
    %c0_8 = arith.constant 0 : index
    %c0_9 = arith.constant 0 : index
    %10 = vector.load %arg4[%c0_7, %c0_8, %c0_9] : memref<1x4x256xf32, #tpu.memory_space<vmem>>, vector<1x4x256xf32>
    %11 = vector.shape_cast %10 : vector<1x4x256xf32> to vector<4x256xf32>
    %12 = vector.shape_cast %9 : vector<4x256xf32> to vector<1x4x256xf32>
    tpu.vector_store %arg4[%c0_7, %c0_8, %c0_9], %12 {strides = array<i32>} : memref<1x4x256xf32, #tpu.memory_space<vmem>>, vector<1x4x256xf32>,
    return
  }
  func.func @transform_0(%arg0: i32, %arg1: i32) -> (i32, i32) {
    %c1_i32 = arith.constant 1 : i32
    %0 = arith.muli %arg0, %c1_i32 : i32
    %1 = arith.addi %0, %arg1 : i32
    %c0_i32 = arith.constant 0 : i32
    %c0_i32_0 = arith.constant 0 : i32
    return %c0_i32, %1 : i32, i32
  }
  func.func @transform_1(%arg0: i32, %arg1: i32) -> (i32, i32) {
    %c1_i32 = arith.constant 1 : i32
    %0 = arith.muli %arg0, %c1_i32 : i32
    %1 = arith.addi %0, %arg1 : i32
    %c0_i32 = arith.constant 0 : i32
    %c0_i32_0 = arith.constant 0 : i32
    return %c0_i32, %1 : i32, i32
  }
  func.func @transform_2(%arg0: i32, %arg1: i32) -> (i32, i32, i32) {
    %c0_i32 = arith.constant 0 : i32
    %c0_i32_0 = arith.constant 0 : i32
    %c0_i32_1 = arith.constant 0 : i32
    return %arg0, %c0_i32, %c0_i32_0 : i32, i32, i32
  }
}

</mosaic_0001>

<bundles_post_ra>
// kernel: tpu_custom_call.1
= control target key start
LH: loop header
LB: loop body
LE: loop exit
PB: predicated region body
PF: predicated region fallthrough
CT: control target
= control target key end

     0   :  { %7 = vsyncpa [#allocation3], 0  ;;  %s206_s0 = inlined_call_operand.hbm [shape: f32[4,256], index: 0, kind: input, shape index: {}]   ;;  %s207_s1 = inlined_call_operand.hbm [shape: f32[4,256], index: 1, kind: input, shape index: {}]   ;;  %s208_s2 = inlined_call_operand.hbm [shape: f32[1,4,256], index: 2, kind: output, shape index: {}]  }
   0x1   :  { %8 = vsyncpa [#allocation6], 0 }
   0x2   :  { %9 = vsyncpa [#allocation4], 0  ;;  %s152_s9 = smov [#allocation2]   ;;  %s153_s11 = smov [#allocation5]  }
   0x3   :  { %s20_s10 = sshll.u32 %s152_s9, 4  ;;  %s34_s12 = sshll.u32 %s153_s11, 4  ;;  %s21_s10 = int_to_ptr.vmem [resolvable:$true] %s20_s10  ;;  %s35_s12 = int_to_ptr.vmem [resolvable:$true] %s34_s12 }
   0x4   :  { %s80_s15 = scalar_lea.hbm %s206_s0, 128 }
   0x5   :  { %p81_p0 = scmp.ne.s32.totalorder %s206_s0, %s80_s15  ;;  %p84_p1 = scmp.lt.u32.totalorder %s80_s15, %s206_s0 }
   0x7   :  { %p86_p2 = pnand %p84_p1, %p81_p0 }
   0x9   :  { %89 = shalt.err (!%p86_p2)
}
   0xa   :  { %s90_s20 = scalar_lea.vmem %s21_s10, 128  ;;  %p95_p4 = scmp.lt.s32.totalorder %s21_s10, %s21_s10 }
   0xb   :  { %p91_p3 = scmp.ne.s32.totalorder %s21_s10, %s90_s20  ;;  %p96_p5 = scmp.lt.s32.totalorder %s90_s20, %s90_s20 }
   0xd   :  { %p97_p6 = por %p96_p5, %p95_p4 }
   0xf   :  { %p98_p7 = pnand %p97_p6, %p91_p3 }
  0x11   :  { %101 = shalt.err (!%p98_p7)
}
  0x12   :  { %23 = dma.hbm_to_vmem [thread:$0]  %s206_s0, 128, %s21_s10, [#allocation3]  }
  0x13   :  { %s102_s25 = scalar_lea.hbm %s207_s1, 128 }
  0x14   :  { %p103_p8 = scmp.ne.s32.totalorder %s207_s1, %s102_s25  ;;  %p106_p9 = scmp.lt.u32.totalorder %s102_s25, %s207_s1 }
  0x16   :  { %p108_p10 = pnand %p106_p9, %p103_p8 }
  0x18   :  { %111 = shalt.err (!%p108_p10)
}
  0x19   :  { %s112_s30 = scalar_lea.vmem %s35_s12, 128  ;;  %p117_p12 = scmp.lt.s32.totalorder %s35_s12, %s35_s12 }
  0x1a   :  { %p113_p11 = scmp.ne.s32.totalorder %s35_s12, %s112_s30  ;;  %p118_p13 = scmp.lt.s32.totalorder %s112_s30, %s112_s30 }
  0x1c   :  { %p119_p0 = por %p118_p13, %p117_p12 }
  0x1e   :  { %p120_p1 = pnand %p119_p0, %p113_p11 }
  0x20   :  { %123 = shalt.err (!%p120_p1)
}
  0x21   :  { %37 = dma.hbm_to_vmem [thread:$0]  %s207_s1, 128, %s35_s12, [#allocation6]  }
  0x22   :  { %146 = dma.done.wait [#allocation3], 128  }
  0x23   :  { %147 = vsyncadd [#allocation3], 4294967168 }
  0x24   :  { %148 = dma.done.wait [#allocation6], 128  }
  0x25   :  { %149 = vsyncadd [#allocation6], 4294967168  ;;  %v53_v0 = vld [vmem:[#allocation5] sm:$0xff]  ;;  %v54_v1 = vld [vmem:[#allocation2] sm:$0xff]  ;;  %s154_s4 = smov [#allocation7]  }
  0x26   :  { %v55_v2 = vsub.f32 %v53_v0, %v54_v1  ;;  %s66_s5 = sshll.u32 %s154_s4, 4  ;;  %s67_s5 = int_to_ptr.vmem [resolvable:$true] %s66_s5 }
  0x27   :  { %s124_s6 = scalar_lea.vmem %s67_s5, 128  ;;  %p129_p3 = scmp.lt.s32.totalorder %s67_s5, %s67_s5 }
  0x28   :  { %v56_v3 = vand.u32 2147483647, %v55_v2  ;;  %p125_p2 = scmp.ne.s32.totalorder %s67_s5, %s124_s6  ;;  %p130_p4 = scmp.lt.s32.totalorder %s124_s6, %s124_s6 }
  0x2a   :  { %59 = vst [vmem:[#allocation7] sm:$0xff] %v56_v3  ;;  %p131_p5 = por %p130_p4, %p129_p3 }
  0x2c   :  { %p132_p6 = pnand %p131_p5, %p125_p2 }
  0x2e   :  { %135 = shalt.err (!%p132_p6)
}
  0x2f   :  { %s136_s8 = scalar_lea.hbm %s208_s2, 128 }
  0x30   :  { %p137_p7 = scmp.ne.s32.totalorder %s208_s2, %s136_s8  ;;  %p140_p8 = scmp.lt.u32.totalorder %s136_s8, %s208_s2 }
  0x32   :  { %p142_p9 = pnand %p140_p8, %p137_p7 }
  0x34   :  { %145 = shalt.err (!%p142_p9)
}
  0x35   :  { %69 = dma.vmem_to_hbm [thread:$0]  %s67_s5, 128, %s208_s2, [#allocation4]  }
  0x36   :  { %150 = dma.done.wait [#allocation4], 128  }
  0x37   :  { %151 = vsyncadd [#allocation4], 4294967168 }
  0x38   :  { %73 = vsyncpa [#allocation3], 1 }
  0x39   :  { %74 = vsyncpa [#allocation6], 1 }
  0x3a   :  { %75 = vsyncpa [#allocation4], 1 }

</bundles_post_ra>
